<compile_context>
chip_gen: v6e
topology: v6e:2x2x1
jax: 0.10.0
libtpu: 0.0.40
codegen_flags: <defaults>
</compile_context>

<pallas_src>
import jax
import jax.numpy as jnp
from jax.experimental import pallas as pl
from jax.experimental.pallas import tpu as pltpu


def _attention_kernel(h_ref, w1t_ref, b1_ref, w2_ref, o_ref):
    # h_ref  : VMEM (Bb, S, H)  batch-block of hidden states (input dtype)
    # w1t_ref: VMEM (H, H)      first linear weight, pre-transposed, matmul dtype (bf16)
    # b1_ref : VMEM (1, H)      first linear bias (f32)
    # w2_ref : VMEM (1, H)      second linear weight as a row vector (f32)
    # o_ref  : VMEM (Bb, H)     attended output for this batch block
    Bb, S, H = h_ref.shape
    h = h_ref[...]                                                 # (Bb, S, H)

    # Linear1 + tanh: one MXU matmul on the flattened (Bb*S, H) tile.
    # bf16 operands, f32 accumulator. (Reshapes are views when S is a multiple
    # of the sublane count; see host-side note.)
    hf = h.reshape(Bb * S, H).astype(w1t_ref.dtype)
    z = jnp.tanh(
        jnp.dot(hf, w1t_ref[...], preferred_element_type=jnp.float32)
        + b1_ref[...]
    )                                                              # (Bb*S, H) f32

    # Linear2 (output width 1): VPU multiply + lane-axis reduce; scores stay
    # lane-dense as (Bb, S). The scalar bias b2 is dropped (softmax shift-inv.).
    scores = jnp.sum(z.reshape(Bb, S, H) * w2_ref[...], axis=-1)   # (Bb, S) f32

    # Softmax over the sequence (lane) axis.
    m = jnp.max(scores, axis=-1, keepdims=True)
    e = jnp.exp(scores - m)
    inv_denom = pl.reciprocal(jnp.sum(e, axis=-1, keepdims=True), approx=True)
    attn = e * inv_denom                                           # (Bb, S) f32

    # Weighted sum over S on the VPU/XLU (multiply promotes h to f32 elementwise,
    # sublane reduce accumulates in f32) -- no materialized f32 copy of h and the
    # MXU stays free for the next block's Linear1.
    attended = jnp.sum(h * attn[:, :, None], axis=1)               # (Bb, H) f32
    o_ref[...] = attended.astype(o_ref.dtype)


def _pick_block_b(B, bb_cap):
    """Choose a batch-block size.

    Invariants (keep the (8,128) output-tile rule happy): either block_b equals
    the (padded) batch, or block_b is a multiple of 8. Prefers divisors of B so
    no host-side padding is needed.
    """
    bb_cap = max(1, int(bb_cap))
    if bb_cap >= B:
        # Whole batch fits in one block. Give v7x's second TensorCore work when
        # we can split into two equal 8-aligned blocks without padding.
        if B >= 16 and B % 16 == 0:
            return B // 2
        return B
    cap8 = max(8, (bb_cap // 8) * 8)
    # Largest multiple of 8 that divides B and fits the budget -> no padding.
    for d in range(cap8, 7, -8):
        if B % d == 0:
            return d
    return cap8  # requires padding B up to a multiple of cap8


def attention_layer(hidden_states, w1, b1, w2, b2=None, block_b=None,
                    matmul_dtype=jnp.bfloat16):
    """Forward pass of AttentionLayer.

    hidden_states: (B, S, H). PyTorch Linear conventions:
      w1: (H, H) [out, in], b1: (H,), w2: (1, H) [out, in], b2: (1,).
    b2 is accepted for API parity but unused (softmax is invariant to adding the
    same scalar to every score). Returns (B, H).
    """
    B, S, H = hidden_states.shape
    dtype = hidden_states.dtype
    h_item = jnp.dtype(dtype).itemsize
    out_item = h_item
    mm_item = jnp.dtype(matmul_dtype).itemsize

    # --- Generation-aware VMEM budgeting -------------------------------------
    try:
        vmem_cap = int(pltpu.get_tpu_info().vmem_capacity_bytes)
    except Exception:
        vmem_cap = 64 * 1024 * 1024  # conservative fallback (v7x per-core VMEM)
    budget = min(vmem_cap // 2, 48 * 1024 * 1024)   # leave double-buffer headroom

    # Full live footprint per batch row in a block:
    #   2x double-buffered h tile + bf16 matmul copy + f32 z + f32 weighted-sum
    #   product + softmax temporaries + double-buffered output row.
    per_row = S * H * (2 * h_item + mm_item + 4 + 4) + 2 * H * out_item + 16 * S
    fixed = H * H * mm_item + 4 * H * 4              # w1t (single-buffered) + b1/w2

    if block_b is None:
        avail = max(budget - fixed, per_row)
        bb_cap = avail // per_row
        block_b = _pick_block_b(B, bb_cap)
    block_b = max(1, min(int(block_b), B))

    footprint = fixed + block_b * per_row
    vmem_limit = int(min(vmem_cap, max(32 * 1024 * 1024, 2 * footprint)))

    # --- Batch padding (only hit when no suitable divisor of B exists) --------
    pad = (-B) % block_b
    if pad:
        hidden_states = jnp.pad(hidden_states, ((0, pad), (0, 0), (0, 0)))
    padded_b = B + pad
    num_blocks = padded_b // block_b

    # NOTE: reshapes inside the kernel are free when S is a multiple of the
    # sublane count (8 for f32, 16 for bf16 inputs); otherwise they cost a
    # tile-sized VMEM copy but remain correct.

    w1t = jnp.asarray(w1).T.astype(matmul_dtype)     # (H, H): x @ W1.T -> x @ w1t
    b1r = jnp.asarray(b1).reshape(1, H).astype(jnp.float32)
    w2r = jnp.asarray(w2).reshape(1, H).astype(jnp.float32)

    grid_spec = pltpu.PrefetchScalarGridSpec(
        num_scalar_prefetch=0,
        grid=(num_blocks,),
        in_specs=[
            pl.BlockSpec((block_b, S, H), lambda i: (i, 0, 0)),
            # Grid-constant operands: single-buffer (constant index_map, so
            # double-buffering only wastes VMEM).
            pl.BlockSpec((H, H), lambda i: (0, 0), pipeline_mode=pl.Buffered(1)),
            pl.BlockSpec((1, H), lambda i: (0, 0), pipeline_mode=pl.Buffered(1)),
            pl.BlockSpec((1, H), lambda i: (0, 0), pipeline_mode=pl.Buffered(1)),
        ],
        out_specs=pl.BlockSpec((block_b, H), lambda i: (i, 0)),
    )

    cost = pl.CostEstimate(
        flops=int(2 * B * S * H * H + 4 * B * S * H),
        transcendentals=int(B * S * H + B * S),
        bytes_accessed=int(B * S * H * h_item + H * H * mm_item
                           + 2 * H * 4 + B * H * out_item),
    )

    out = pl.pallas_call(
        _attention_kernel,
        out_shape=jax.ShapeDtypeStruct((padded_b, H), dtype),
        grid_spec=grid_spec,
        compiler_params=pltpu.CompilerParams(
            # Batch blocks are independent -> shard across TensorCores on v7x.
            dimension_semantics=("parallel",),
            vmem_limit_bytes=vmem_limit,
        ),
        cost_estimate=cost,
    )(hidden_states, w1t, b1r, w2r)

    return out[:B]


def _reference(hidden_states, w1, b1, w2, b2):
    # Pure-JAX f32 reference of the PyTorch forward (keeps b2; it is a no-op).
    z = jnp.tanh(hidden_states @ w1.T + b1)                   # (B, S, H)
    scores = (z @ w2.T + b2).squeeze(-1)                      # (B, S)
    attn = jax.nn.softmax(scores, axis=-1)                    # (B, S)
    return jnp.sum(hidden_states * attn[..., None], axis=1)   # (B, H)


if __name__ == "__main__":
    B, S, H = 2, 8, 32
    key = jax.random.PRNGKey(0)
    k_x, k_w1, k_b1, k_w2, k_b2 = jax.random.split(key, 5)

    x = jax.random.normal(k_x, (B, S, H), dtype=jnp.float32)
    # PyTorch Linear shapes: weight (out, in), bias (out,)
    w1 = jax.random.normal(k_w1, (H, H), dtype=jnp.float32) * 0.1
    b1 = jax.random.normal(k_b1, (H,), dtype=jnp.float32) * 0.1
    w2 = jax.random.normal(k_w2, (1, H), dtype=jnp.float32) * 0.1
    b2 = jax.random.normal(k_b2, (1,), dtype=jnp.float32) * 0.1

    out = attention_layer(x, w1, b1, w2, b2)
    out = jax.block_until_ready(out)

    ref = _reference(x, w1, b1, w2, b2)
    assert out.shape == (B, H)
    # Tolerance accounts for the bf16 MXU operands in Linear1 (~0.4% relative on
    # the pre-softmax scores) and the EUP approximate reciprocal in the softmax
    # normalizer; everything else accumulates in f32.
    err = jnp.max(jnp.abs(out - ref))
    assert jnp.allclose(out, ref, atol=2e-2, rtol=2e-2), f"max abs err {err}"
    print("KERNEL_OK")
</pallas_src>

<mosaic_0001>
module attributes {stable_mosaic.version = 11 : i64} {
  func.func @_attention_kernel(%arg0: i32, %arg1: memref<2x8x32xf32, #tpu.memory_space<vmem>>, %arg2: memref<32x32xbf16, #tpu.memory_space<vmem>>, %arg3: memref<1x32xf32, #tpu.memory_space<vmem>>, %arg4: memref<1x32xf32, #tpu.memory_space<vmem>>, %arg5: memref<2x32xf32, #tpu.memory_space<vmem>>) attributes {dimension_semantics = [#tpu.dimension_semantics<parallel>], iteration_bounds = array<i64: 1>, scalar_prefetch = 0 : i64, scratch_operands = 0 : i64, tpu.core_type = #tpu.core_type<tc>, window_params = [{transform_indices = @transform_0, window_bounds = array<i64: 2, 8, 32>}, {pipeline_mode = #tpu.pipeline_mode<synchronous>, transform_indices = @transform_1, window_bounds = array<i64: 32, 32>}, {pipeline_mode = #tpu.pipeline_mode<synchronous>, transform_indices = @transform_2, window_bounds = array<i64: 1, 32>}, {pipeline_mode = #tpu.pipeline_mode<synchronous>, transform_indices = @transform_3, window_bounds = array<i64: 1, 32>}, {transform_indices = @transform_4, window_bounds = array<i64: 2, 32>}]} {
    %c0 = arith.constant 0 : index
    %c0_0 = arith.constant 0 : index
    %c0_1 = arith.constant 0 : index
    %0 = vector.load %arg1[%c0, %c0_0, %c0_1] : memref<2x8x32xf32, #tpu.memory_space<vmem>>, vector<2x8x32xf32>
    %1 = vector.shape_cast %0 : vector<2x8x32xf32> to vector<16x32xf32>
    %2 = arith.truncf %1 : vector<16x32xf32> to vector<16x32xbf16>
    %c0_2 = arith.constant 0 : index
    %c0_3 = arith.constant 0 : index
    %3 = vector.load %arg2[%c0_2, %c0_3] : memref<32x32xbf16, #tpu.memory_space<vmem>>, vector<32x32xbf16>
    %cst = arith.constant dense<0.000000e+00> : vector<16x32xf32>
    %4 = tpu.matmul %2, %3, %cst {dimension_numbers = #tpu.dot_dimension_numbers<[1], [0], [0], [1], [0, 0, 1, 1], [], []>} : vector<16x32xbf16>, vector<32x32xbf16>, vector<16x32xf32> -> vector<16x32xf32>
    %c0_4 = arith.constant 0 : index
    %c0_5 = arith.constant 0 : index
    %5 = vector.load %arg3[%c0_4, %c0_5] : memref<1x32xf32, #tpu.memory_space<vmem>>, vector<1x32xf32>
    %6 = vector.broadcast %5 : vector<1x32xf32> to vector<16x32xf32>
    %7 = arith.addf %4, %6 : vector<16x32xf32>
    %8 = math.tanh %7 : vector<16x32xf32>
    %9 = vector.shape_cast %8 : vector<16x32xf32> to vector<2x8x32xf32>
    %c0_6 = arith.constant 0 : index
    %c0_7 = arith.constant 0 : index
    %10 = vector.load %arg4[%c0_6, %c0_7] : memref<1x32xf32, #tpu.memory_space<vmem>>, vector<1x32xf32>
    %11 = vector.shape_cast %10 : vector<1x32xf32> to vector<1x1x32xf32>
    %12 = vector.broadcast %11 : vector<1x1x32xf32> to vector<2x8x32xf32>
    %13 = arith.mulf %9, %12 : vector<2x8x32xf32>
    %cst_8 = arith.constant dense<0.000000e+00> : vector<2x8xf32>
    %14 = vector.multi_reduction <add>, %13, %cst_8 [2] : vector<2x8x32xf32> to vector<2x8xf32>
    %cst_9 = arith.constant dense<0xFF800000> : vector<2xf32>
    %15 = vector.multi_reduction <maximumf>, %14, %cst_9 [1] : vector<2x8xf32> to vector<2xf32>
    %16 = vector.shape_cast %15 : vector<2xf32> to vector<2x1xf32>
    %17 = vector.broadcast %16 : vector<2x1xf32> to vector<2x8xf32>
    %18 = arith.subf %14, %17 : vector<2x8xf32>
    %19 = math.exp %18 : vector<2x8xf32>
    %cst_10 = arith.constant dense<0.000000e+00> : vector<2xf32>
    %20 = vector.multi_reduction <add>, %19, %cst_10 [1] : vector<2x8xf32> to vector<2xf32>
    %21 = vector.shape_cast %20 : vector<2xf32> to vector<2x1xf32>
    %22 = tpu.reciprocal %21 {approx = true} : vector<2x1xf32> -> vector<2x1xf32>
    %23 = vector.broadcast %22 : vector<2x1xf32> to vector<2x8xf32>
    %24 = arith.mulf %19, %23 : vector<2x8xf32>
    %25 = vector.shape_cast %24 : vector<2x8xf32> to vector<2x8x1xf32>
    %26 = vector.broadcast %25 : vector<2x8x1xf32> to vector<2x8x32xf32>
    %27 = arith.mulf %0, %26 : vector<2x8x32xf32>
    %cst_11 = arith.constant dense<0.000000e+00> : vector<2x32xf32>
    %28 = vector.multi_reduction <add>, %27, %cst_11 [1] : vector<2x8x32xf32> to vector<2x32xf32>
    %c0_12 = arith.constant 0 : index
    %c0_13 = arith.constant 0 : index
    %29 = vector.load %arg5[%c0_12, %c0_13] : memref<2x32xf32, #tpu.memory_space<vmem>>, vector<2x32xf32>
    tpu.vector_store %arg5[%c0_12, %c0_13], %28 {strides = array<i32>} : memref<2x32xf32, #tpu.memory_space<vmem>>, vector<2x32xf32>,
    return
  }
  func.func @transform_0(%arg0: i32) -> (i32, i32, i32) {
    %c0_i32 = arith.constant 0 : i32
    %c0_i32_0 = arith.constant 0 : i32
    %c0_i32_1 = arith.constant 0 : i32
    return %arg0, %c0_i32, %c0_i32_0 : i32, i32, i32
  }
  func.func @transform_1(%arg0: i32) -> (i32, i32) {
    %c0_i32 = arith.constant 0 : i32
    %c0_i32_0 = arith.constant 0 : i32
    %c0_i32_1 = arith.constant 0 : i32
    return %c0_i32, %c0_i32_0 : i32, i32
  }
  func.func @transform_2(%arg0: i32) -> (i32, i32) {
    %c0_i32 = arith.constant 0 : i32
    %c0_i32_0 = arith.constant 0 : i32
    %c0_i32_1 = arith.constant 0 : i32
    return %c0_i32, %c0_i32_0 : i32, i32
  }
  func.func @transform_3(%arg0: i32) -> (i32, i32) {
    %c0_i32 = arith.constant 0 : i32
    %c0_i32_0 = arith.constant 0 : i32
    %c0_i32_1 = arith.constant 0 : i32
    return %c0_i32, %c0_i32_0 : i32, i32
  }
  func.func @transform_4(%arg0: i32) -> (i32, i32) {
    %c0_i32 = arith.constant 0 : i32
    %c0_i32_0 = arith.constant 0 : i32
    return %arg0, %c0_i32 : i32, i32
  }
}

</mosaic_0001>

<bundles_post_ra>
// kernel: tpu_custom_call.1
= control target key start
LH: loop header
LB: loop body
LE: loop exit
PB: predicated region body
PF: predicated region fallthrough
CT: control target
= control target key end

     0   :  { %9 = vsyncpa [#allocation3], 0  ;;  %s428_s0 = inlined_call_operand.hbm [shape: f32[2,8,32], index: 0, kind: input, shape index: {}]   ;;  %s429_s1 = inlined_call_operand.hbm [shape: bf16[32,32], index: 1, kind: input, shape index: {}]   ;;  %s430_s2 = inlined_call_operand.vmem [shape: f32[1,32], index: 2, kind: input, shape index: {}]   ;;  %s431_s3 = inlined_call_operand.vmem [shape: f32[1,32], index: 3, kind: input, shape index: {}]   ;;  %s432_s4 = inlined_call_operand.hbm [shape: f32[2,32], index: 4, kind: output, shape index: {}]  }
   0x1   :  { %10 = vsyncpa [#allocation6], 0 }
   0x2   :  { %11 = vsyncpa [#allocation4], 0  ;;  %s360_s15 = smov [#allocation2]  }
   0x3   :  { %s17_s16 = sshll.u32 %s360_s15, 4  ;;  %s18_s16 = int_to_ptr.vmem [resolvable:$true] %s17_s16 }
   0x4   :  { %s302_s17 = scalar_lea.vmem %s18_s16, 256  ;;  %p307_p1 = scmp.lt.s32.totalorder %s18_s16, %s18_s16 }
   0x5   :  { %p303_p0 = scmp.ne.s32.totalorder %s18_s16, %s302_s17  ;;  %p308_p2 = scmp.lt.s32.totalorder %s302_s17, %s302_s17 }
   0x7   :  { %p309_p3 = por %p308_p2, %p307_p1 }
   0x9   :  { %p310_p4 = pnand %p309_p3, %p303_p0 }
   0xb   :  { %313 = shalt.err (!%p310_p4)
}
   0xc   :  { %s361_s18 = smov 128   ;;  %s362_s19 = smov 8  }
   0xd   :  { %23 = dma.hbm_to_vmem [thread:$0]  %s428_s0, 256, %s18_s16, [#allocation3], %s361_s18, %s361_s18, %s362_s19  }
   0xe   :  { %s363_s22 = smov [#allocation5]  }
   0xf   :  { %s29_s23 = sshll.u32 %s363_s22, 4  ;;  %s30_s23 = int_to_ptr.vmem [resolvable:$true] %s29_s23 }
  0x10   :  { %s322_s24 = scalar_lea.vmem %s30_s23, 256  ;;  %p327_p6 = scmp.lt.s32.totalorder %s30_s23, %s30_s23 }
  0x11   :  { %p323_p5 = scmp.ne.s32.totalorder %s30_s23, %s322_s24  ;;  %p328_p7 = scmp.lt.s32.totalorder %s322_s24, %s322_s24 }
  0x13   :  { %p329_p8 = por %p328_p7, %p327_p6 }
  0x15   :  { %p330_p9 = pnand %p329_p8, %p323_p5 }
  0x17   :  { %333 = shalt.err (!%p330_p9)
}
  0x18   :  { %s364_s25 = smov 64   ;;  %s365_s26 = smov 4  }
  0x19   :  { %35 = dma.hbm_to_vmem [thread:$0]  %s429_s1, 256, %s30_s23, [#allocation6], %s364_s25, %s364_s25, %s365_s26  }
  0x1a   :  { %354 = dma.done.wait [#allocation3], 256  }
  0x1b   :  { %355 = vsyncadd [#allocation3], 4294967040 }
  0x1c   :  { %356 = dma.done.wait [#allocation6], 256  }
  0x1d   :  { %357 = vsyncadd [#allocation6], 4294967040  ;;  %v366_v0 = vmov 0.0   ;;  %vm367_vm0 = vmmov 0   ;;  %v282_v1 = vld [vmem:[#allocation5 + $0x8] sm:$0xff]   ;;  %v283_v2 = vld [vmem:[#allocation5] sm:$0xff]   ;;  %v137_v20 = vlaneseq }
  0x1e   :  { %262 = vmatprep.subr.bf16.mxu0 %v366_v0  ;;  %266 = vmatprep.mubr.msk.bf16.mxu0 %vm367_vm0, %v366_v0  ;;  %v401_v3 = vld [vmem:[#allocation2] sm:$0xff]  ;;  %v403_v4 = vld [vmem:[#allocation2 + $0x8] sm:$0xff]  ;;  %vm73_vm1 = vcmask 261120   ;;  %vm147_vm2 = vcmask 1041409   ;;  %vm150_vm3 = vcmask 58368   ;;  %v368_v30 = vmov 0  }
  0x1f   :  { %263 = vmatpush3.bf16.msra.mxu0 %v282_v1  ;;  %v49_v5 = vpack.c.bf16 %v403_v4, %v401_v3  ;;  %v254_v6 = vld [vmem:[%s430_s2] ss:$0 sm:$0xff]  ;;  %v138_v21 = vand.u32 127, %v137_v20  ;;  %v140_v22 = vshrl.u32 %v137_v20, 7  ;;  %281 = vset.pattern.permute.xlu0 %v368_v30  ;;  %s369_s2 = smov [#allocation7]   ;;  %vm236_vm4 = vcmask 254976  }
  0x20   :  { %264 = vmatprep.subr.bf16.mxu0 %v366_v0  ;;  %v258_v13 = vld [vmem:[%s431_s3] ss:$0 sm:$0xff]  ;;  %280 = vset.pattern.permute.xlu1 %v368_v30  ;;  %s244_s3 = sshll.u32 %s369_s2, 4  ;;  %s245_s3 = int_to_ptr.vmem [resolvable:$true] %s244_s3 }
  0x21   :  { %v141_v24 = vsub.s32 %v138_v21, %v140_v22  ;;  %v157_v31 = vsub.s32 0, %v140_v22  ;;  %v161_v32 = vsub.s32 1, %v140_v22  ;;  %s334_s5 = scalar_lea.vmem %s245_s3, 32  ;;  %p339_p11 = scmp.lt.s32.totalorder %s245_s3, %s245_s3 }
  0x22   :  { %p335_p10 = scmp.ne.s32.totalorder %s245_s3, %s334_s5  ;;  %p340_p12 = scmp.lt.s32.totalorder %s334_s5, %s334_s5 }
  0x23   :  { %265 = vmatpush3.bf16.msra.mxu0 %v283_v2 }
  0x24   :  { %p341_p13 = por %p340_p12, %p339_p11 }
  0x26   :  { %267 = vmatmul.mubr.msk.bf16.vlgmr.msra.gmra.mxu0 %vm73_vm1, %v49_v5  ;;  %p342_p0 = pnand %p341_p13, %p335_p10 }
  0xe6   :  { %v111_v7 = vpop.f32.mrf.mxu0 }
  0xe7   :  { %v112_v8 = vadd.f32 %v254_v6, %v111_v7 }
  0xe8   :  { %v268_v9 = vpop.f32.mrf.mxu0 }
  0xe9   :  { %284 = vtanh.f32 %v112_v8 }
  0xea   :  { %v114_v10 = vpop.f32.mrf.mxu0 }
  0xeb   :  { %v115_v11 = vadd.f32 %v254_v6, %v114_v10 }
  0xec   :  { %v269_v12 = vpop.f32.mrf.mxu0 }
  0xed   :  { %286 = vtanh.f32 %v115_v11 }
  0xf6   :  { %v285_v14 = vpop.eup %284 }
  0xf7   :  { %v127_v15 = vmul.f32 %v285_v14, %v258_v13 }
  0xf9   :  { %v129_v16 = vsel %vm73_vm1, %v127_v15, 0.0 }
  0xfa   :  { %v287_v17 = vpop.eup %286  ;;  %130 = vadd.xlane.f32.xlu0 %v129_v16 }
  0xfb   :  { %v128_v18 = vmul.f32 %v287_v17, %v258_v13 }
  0xfd   :  { %v132_v19 = vsel %vm73_vm1, %v128_v18, 0.0 }
  0xfe   :  { %133 = vadd.xlane.f32.xlu0 %v132_v19 }
 0x183   :  { %v131_v23 = vpop.xlane.xlu0 %130 }
 0x184   :  { %v142_v26 = vrot.slane %v131_v23, %v141_v24 }
 0x187   :  { %v134_v25 = vpop.xlane.xlu0 %133 }
 0x188   :  { %v146_v27 = vrot.slane %v134_v25, %v141_v24 }
 0x18a   :  { %v148_v28 = vsel %vm147_vm2, %v146_v27, %v142_v26 }
 0x18b   :  { %v151_v29 = vsel %vm150_vm3, %v148_v28, -inf }
 0x18c   :  { %152 = vmax.xlane.f32.xlu1 %v151_v29 }
 0x215   :  { %v153_v33 = vpop.xlane.xlu1 %152 }
 0x216   :  { %v158_v34 = vrot.slane %v153_v33, %v157_v31  ;;  %v162_v35 = vrot.slane %v153_v33, %v161_v32 }
 0x218   :  { %v165_v36 = vsub.f32 %v131_v23, %v158_v34  ;;  %v166_v37 = vsub.f32 %v134_v25, %v162_v35 }
 0x21a   :  { %v167_v38 = vmul.f32 1.442695, %v165_v36  ;;  %v169_v39 = vmul.f32 1.442695, %v166_v37 }
 0x21c   :  { %288 = vpow2.f32 %v167_v38 }
 0x21d   :  { %290 = vpow2.f32 %v169_v39 }
 0x229   :  { %v289_v40 = vpop.eup %288 }
 0x22a   :  { %v291_v41 = vpop.eup %290  ;;  %174 = vperm.xlu1 %280, %v289_v40  }
 0x22b   :  { %177 = vperm.xlu0 %281, %v291_v41  }
 0x2a5   :  { %v175_v42 = vpop.permute.xlu1 %174 }
 0x2a6   :  { %v178_v43 = vpop.permute.xlu0 %177  ;;  %v182_v44 = vrot.slane %v175_v42, %v141_v24 }
 0x2a7   :  { %v186_v45 = vrot.slane %v178_v43, %v141_v24 }
 0x2a9   :  { %v187_v46 = vsel %vm147_vm2, %v186_v45, %v182_v44 }
 0x2aa   :  { %v189_v47 = vsel %vm150_vm3, %v187_v46, 0.0 }
 0x2ab   :  { %190 = vadd.xlane.f32.xlu1 %v189_v47 }
 0x334   :  { %v191_v48 = vpop.xlane.xlu1 %190 }
 0x335   :  { %292 = vrcp.f32 %v191_v48 }
 0x342   :  { %v293_v49 = vpop.eup %292 }
 0x343   :  { %v197_v50 = vrot.slane %v293_v49, %v157_v31  ;;  %v201_v52 = vrot.slane %v293_v49, %v161_v32 }
 0x345   :  { %v204_v51 = vmul.f32 %v289_v40, %v197_v50  ;;  %v205_v53 = vmul.f32 %v291_v41, %v201_v52 }
 0x347   :  { %208 = vperm.xlu0 %281, %v204_v51  }
 0x34b   :  { %213 = vperm.xlu0 %281, %v205_v53  }
 0x3c2   :  { %v209_v54 = vpop.permute.xlu0 %208 }
 0x3c3   :  { %v216_v55 = vmul.f32 %v209_v54, %v401_v3 }
 0x3c5   :  { %v218_v56 = vsel %vm73_vm1, %v216_v55, 0.0 }
 0x3c6   :  { %v219_v57 = vrot.slane %v218_v56, 4  ;;  %v214_v58 = vpop.permute.xlu0 %213 }
 0x3c7   :  { %v217_v59 = vmul.f32 %v214_v58, %v403_v4 }
 0x3c8   :  { %v220_v60 = vadd.f32 %v219_v57, %v218_v56 }
 0x3c9   :  { %v225_v61 = vsel %vm73_vm1, %v217_v59, 0.0 }
 0x3ca   :  { %v221_v62 = vrot.slane %v220_v60, 2  ;;  %v226_v63 = vrot.slane %v225_v61, 4 }
 0x3cc   :  { %v222_v0 = vadd.f32 %v221_v62, %v220_v60  ;;  %v227_v1 = vadd.f32 %v226_v63, %v225_v61 }
 0x3ce   :  { %v228_v2 = vrot.slane %v227_v1, 2  ;;  %v223_v5 = vrot.slane %v222_v0, 1 }
 0x3d0   :  { %v229_v6 = vadd.f32 %v228_v2, %v227_v1  ;;  %v224_v3 = vadd.f32 %v223_v5, %v222_v0 }
 0x3d2   :  { %v230_v7 = vrot.slane %v229_v6, 1 }
 0x3d4   :  { %v231_v8 = vadd.f32 %v230_v7, %v229_v6 }
 0x3d6   :  { %v234_v9 = vsel %vm147_vm2, %v231_v8, %v224_v3 }
 0x3d7   :  { %237 = vst.msk [vmem:[#allocation7] sm:$0x3] %vm236_vm4, %v234_v9 }
 0x3d8   :  { %345 = shalt.err (!%p342_p0)
}
 0x3d9   :  { %247 = dma.vmem_to_hbm [thread:$0]  %s245_s3, 32, %s432_s4, [#allocation4]  }
 0x3da   :  { %358 = dma.done.wait [#allocation4], 32  }
 0x3db   :  { %359 = vsyncadd [#allocation4], 4294967264 }
 0x3dc   :  { %251 = vsyncpa [#allocation3], 1 }
 0x3dd   :  { %252 = vsyncpa [#allocation6], 1 }
 0x3de   :  { %253 = vsyncpa [#allocation4], 1 }

</bundles_post_ra>
